<compile_context>
chip_gen: v7x
topology: tpu7x:2x2x1
jax: 0.10.0
libtpu: 0.0.40
codegen_flags: <defaults>
</compile_context>

<pallas_src>
import jax
import jax.numpy as jnp
from jax import lax
from jax.experimental import pallas as pl
from jax.experimental.pallas import tpu as pltpu


def _round_up(x, m):
    return ((x + m - 1) // m) * m


def _emb_kernel_default_pos(ids_ref, wte_hbm, wpe_ref, out_ref, tok_buf, sem):
    """One (TS, D) tile: manual wte row-gather + contiguous wpe slab + add."""
    t = pl.program_id(0)          # sequence-tile index (slow axis)
    b = pl.program_id(1)          # batch index (fast axis -> wpe slab reuse)
    grid_t = pl.num_programs(0)
    TS = tok_buf.shape[0]
    base = b * (grid_t * TS) + t * TS   # offset into flattened (B, Spad) ids

    # Issue all TS row-gather DMAs; ids are read from SMEM before any .wait().
    def _issue(j, carry):
        row = ids_ref[base + j]
        pltpu.make_async_copy(wte_hbm.at[row], tok_buf.at[j], sem).start()
        return carry
    lax.fori_loop(0, TS, _issue, 0)

    # Drain: one wait per outstanding row copy (src slice irrelevant for wait).
    def _drain(j, carry):
        pltpu.make_async_copy(wte_hbm.at[0], tok_buf.at[j], sem).wait()
        return carry
    lax.fori_loop(0, TS, _drain, 0)

    out_ref[...] = (tok_buf[...] + wpe_ref[...]).astype(out_ref.dtype)


def _emb_kernel_custom_pos(ids_ref, pos_ref, wte_hbm, wpe_hbm, out_ref,
                           tok_buf, pos_buf, sem):
    """Custom position_ids: manual row-gather for both wte and wpe."""
    t = pl.program_id(0)
    b = pl.program_id(1)
    grid_t = pl.num_programs(0)
    TS = tok_buf.shape[0]
    base = b * (grid_t * TS) + t * TS

    def _issue(j, carry):
        tok = ids_ref[base + j]
        pos = pos_ref[base + j]
        pltpu.make_async_copy(wte_hbm.at[tok], tok_buf.at[j], sem).start()
        pltpu.make_async_copy(wpe_hbm.at[pos], pos_buf.at[j], sem).start()
        return carry
    lax.fori_loop(0, TS, _issue, 0)

    def _drain(j, carry):
        pltpu.make_async_copy(wte_hbm.at[0], tok_buf.at[j], sem).wait()
        pltpu.make_async_copy(wpe_hbm.at[0], pos_buf.at[j], sem).wait()
        return carry
    lax.fori_loop(0, TS, _drain, 0)

    out_ref[...] = (tok_buf[...] + pos_buf[...]).astype(out_ref.dtype)


def gpt_embeddings(input_ids, wte, wpe, position_ids=None):
    """input_ids: [B, S] int -> [B, S, n_embd] (= wte[ids] + wpe[pos]); dropout = identity."""
    B, S = input_ids.shape
    V, D = wte.shape
    P, D2 = wpe.shape
    assert D == D2, "wte / wpe embedding dims must match"
    assert wte.dtype == wpe.dtype, "wte / wpe dtypes must match (avoids silent promotion)"
    out_dtype = wte.dtype
    isz = jnp.dtype(out_dtype).itemsize

    # --- tile sizing: big, sublane-aligned tiles, budgeted against VMEM ----------
    VMEM_BUDGET = 32 * 1024 * 1024          # buffers: tok + pos + 2x wpe + 2x out
    ts_cap = max(8, VMEM_BUDGET // (6 * D * isz))
    S8 = _round_up(S, 8)
    TS = min(512, S8, ts_cap)
    TS = max(8, (TS // 8) * 8)              # multiple of 8 (dense sublanes)
    Spad = _round_up(S, TS)
    grid_t = Spad // TS
    grid = (grid_t, B)                      # batch innermost -> wpe slab reuse

    # --- pad / flatten indices (ids clamped; PyTorch would raise on OOB) ---------
    ids = jnp.clip(input_ids.astype(jnp.int32), 0, V - 1)
    if Spad != S:
        ids = jnp.pad(ids, ((0, 0), (0, Spad - S)))
    ids_flat = ids.reshape(B * Spad)

    compiler_params = pltpu.CompilerParams(
        dimension_semantics=("parallel", "parallel"),
        vmem_limit_bytes=48 * 1024 * 1024,
    )

    if position_ids is None:
        # Contiguous positions: wpe loaded as an ordinary Blocked (TS, D) slab.
        wpe_use = wpe if P >= Spad else jnp.pad(wpe, ((0, Spad - P), (0, 0)))
        out = pl.pallas_call(
            _emb_kernel_default_pos,
            out_shape=jax.ShapeDtypeStruct((B, Spad, D), out_dtype),
            grid_spec=pltpu.PrefetchScalarGridSpec(
                num_scalar_prefetch=1,              # ids_flat -> SMEM
                grid=grid,
                in_specs=[
                    pl.BlockSpec(memory_space=pl.ANY),                   # wte in HBM
                    pl.BlockSpec((TS, D), lambda t, b, ids: (t, 0)),     # wpe slab
                ],
                out_specs=pl.BlockSpec((None, TS, D),
                                       lambda t, b, ids: (b, t, 0)),
                scratch_shapes=[
                    pltpu.VMEM((TS, D), out_dtype),          # gathered token rows
                    pltpu.SemaphoreType.DMA(()),
                ],
            ),
            compiler_params=compiler_params,
            cost_estimate=pl.CostEstimate(
                flops=B * Spad * D, transcendentals=0,
                bytes_accessed=(2 * B * Spad * D + Spad * D) * isz + B * Spad * 4),
        )(ids_flat, wte, wpe_use)
    else:
        pos = jnp.clip(position_ids.astype(jnp.int32), 0, P - 1)
        if Spad != S:
            pos = jnp.pad(pos, ((0, 0), (0, Spad - S)))
        pos_flat = pos.reshape(B * Spad)
        out = pl.pallas_call(
            _emb_kernel_custom_pos,
            out_shape=jax.ShapeDtypeStruct((B, Spad, D), out_dtype),
            grid_spec=pltpu.PrefetchScalarGridSpec(
                num_scalar_prefetch=2,              # ids_flat, pos_flat -> SMEM
                grid=grid,
                in_specs=[
                    pl.BlockSpec(memory_space=pl.ANY),   # wte in HBM
                    pl.BlockSpec(memory_space=pl.ANY),   # wpe in HBM
                ],
                out_specs=pl.BlockSpec((None, TS, D),
                                       lambda t, b, ids, pos: (b, t, 0)),
                scratch_shapes=[
                    pltpu.VMEM((TS, D), out_dtype),
                    pltpu.VMEM((TS, D), out_dtype),
                    pltpu.SemaphoreType.DMA(()),
                ],
            ),
            compiler_params=compiler_params,
            cost_estimate=pl.CostEstimate(
                flops=B * Spad * D, transcendentals=0,
                bytes_accessed=3 * B * Spad * D * isz + 2 * B * Spad * 4),
        )(ids_flat, pos_flat, wte, wpe)

    if Spad != S:
        out = out[:, :S, :]
    return out


if __name__ == "__main__":
    # Config (small, consistent with the module): vocab=256, n_positions=64, n_embd=128
    VOCAB, N_POS, N_EMBD = 256, 64, 128
    B, S = 2, 8

    key = jax.random.PRNGKey(0)
    k_wte, k_wpe, k_ids = jax.random.split(key, 3)

    # nn.Embedding weight init: normal(mean=0, std=0.02)
    wte = (0.02 * jax.random.normal(k_wte, (VOCAB, N_EMBD))).astype(jnp.float32)
    wpe = (0.02 * jax.random.normal(k_wpe, (N_POS, N_EMBD))).astype(jnp.float32)

    input_ids = jax.random.randint(k_ids, (B, S), 0, VOCAB, dtype=jnp.int32)
    pos_ids = jnp.broadcast_to(jnp.arange(S, dtype=jnp.int32)[None, :], (B, S))

    # Reference (plain JAX gather) — eval-mode dropout is identity.
    ref = jnp.take(wte, input_ids, axis=0) + jnp.take(wpe, pos_ids, axis=0)

    # Fast path: default (contiguous) positions.
    out = gpt_embeddings(input_ids, wte, wpe)
    out = jax.block_until_ready(out)
    assert out.shape == (B, S, N_EMBD) and out.dtype == jnp.float32
    assert jnp.allclose(out, ref, atol=1e-5, rtol=1e-5)

    # General path: explicit position_ids (same values -> same result).
    out2 = gpt_embeddings(input_ids, wte, wpe, position_ids=pos_ids)
    out2 = jax.block_until_ready(out2)
    assert jnp.allclose(out2, ref, atol=1e-5, rtol=1e-5)

    print("KERNEL_OK")
</pallas_src>

<mosaic_0001>
module attributes {stable_mosaic.version = 11 : i64} {
  func.func @_emb_kernel_default_pos(%arg0: i32, %arg1: i32, %arg2: memref<16xi32, #tpu.memory_space<smem>>, %arg3: memref<256x128xf32, #tpu.memory_space<any>>, %arg4: memref<8x128xf32, #tpu.memory_space<vmem>>, %arg5: memref<1x8x128xf32, #tpu.memory_space<vmem>>, %arg6: memref<8x128xf32, #tpu.memory_space<vmem>>, %arg7: memref<!tpu.dma_semaphore, #tpu.memory_space<semaphore_mem>>) attributes {dimension_semantics = [#tpu.dimension_semantics<parallel>, #tpu.dimension_semantics<parallel>], iteration_bounds = array<i64: 1, 2>, scalar_prefetch = 1 : i64, scratch_operands = 2 : i64, tpu.core_type = #tpu.core_type<tc>, window_params = [{}, {transform_indices = @transform_1, window_bounds = array<i64: 8, 128>}, {transform_indices = @transform_2, window_bounds = array<i64: 1, 8, 128>}]} {
    %c8_i32 = arith.constant 8 : i32
    %0 = arith.muli %arg1, %c8_i32 : i32
    %c8_i32_0 = arith.constant 8 : i32
    %1 = arith.muli %arg0, %c8_i32_0 : i32
    %2 = arith.addi %0, %1 : i32
    %c0_i32 = arith.constant 0 : i32
    %c8_i32_1 = arith.constant 8 : i32
    %3 = arith.addi %c0_i32, %c8_i32_1 : i32
    %c1_i32 = arith.constant 1 : i32
    scf.for %arg8 = %c0_i32 to %3 step %c1_i32  : i32 {
      %11 = arith.addi %2, %arg8 : i32
      %12 = arith.index_cast %11 : i32 to index
      %13 = memref.load %arg2[%12] : memref<16xi32, #tpu.memory_space<smem>>
      %c0_i32_13 = arith.constant 0 : i32
      %14 = tpu.memref_slice %arg3[%13, %c0_i32_13] : memref<256x128xf32, #tpu.memory_space<any>> -> memref<1x128xf32, #tpu.memory_space<any>>
      %15 = tpu.memref_squeeze %14 : memref<1x128xf32, #tpu.memory_space<any>> -> memref<128xf32, #tpu.memory_space<any>>
      %c0_i32_14 = arith.constant 0 : i32
      %16 = tpu.memref_slice %arg6[%arg8, %c0_i32_14] : memref<8x128xf32, #tpu.memory_space<vmem>> -> memref<1x128xf32, #tpu.memory_space<vmem>>
      %17 = tpu.memref_squeeze %16 : memref<1x128xf32, #tpu.memory_space<vmem>> -> memref<128xf32, #tpu.memory_space<vmem>>
      tpu.enqueue_dma source(%15 : memref<128xf32, #tpu.memory_space<any>>) target(%17 : memref<128xf32, #tpu.memory_space<vmem>>) target_semaphore(%arg7 : memref<!tpu.dma_semaphore, #tpu.memory_space<semaphore_mem>>)
    }
    %c8_i32_2 = arith.constant 8 : i32
    %c0_i32_3 = arith.constant 0 : i32
    %c8_i32_4 = arith.constant 8 : i32
    %4 = arith.addi %c0_i32_3, %c8_i32_4 : i32
    %c1_i32_5 = arith.constant 1 : i32
    scf.for %arg8 = %c0_i32_3 to %4 step %c1_i32_5  : i32 {
      %c0_i32_13 = arith.constant 0 : i32
      %c0_i32_14 = arith.constant 0 : i32
      %11 = tpu.memref_slice %arg3[%c0_i32_13, %c0_i32_14] : memref<256x128xf32, #tpu.memory_space<any>> -> memref<1x128xf32, #tpu.memory_space<any>>
      %12 = tpu.memref_squeeze %11 : memref<1x128xf32, #tpu.memory_space<any>> -> memref<128xf32, #tpu.memory_space<any>>
      %c0_i32_15 = arith.constant 0 : i32
      %13 = tpu.memref_slice %arg6[%arg8, %c0_i32_15] : memref<8x128xf32, #tpu.memory_space<vmem>> -> memref<1x128xf32, #tpu.memory_space<vmem>>
      %14 = tpu.memref_squeeze %13 : memref<1x128xf32, #tpu.memory_space<vmem>> -> memref<128xf32, #tpu.memory_space<vmem>>
      tpu.wait_dma2 semaphore(%arg7 : memref<!tpu.dma_semaphore, #tpu.memory_space<semaphore_mem>>) src(%12 : memref<128xf32, #tpu.memory_space<any>>) dst(%14 : memref<128xf32, #tpu.memory_space<vmem>>)
    }
    %c8_i32_6 = arith.constant 8 : i32
    %c0 = arith.constant 0 : index
    %c0_7 = arith.constant 0 : index
    %5 = vector.load %arg6[%c0, %c0_7] : memref<8x128xf32, #tpu.memory_space<vmem>>, vector<8x128xf32>
    %c0_8 = arith.constant 0 : index
    %c0_9 = arith.constant 0 : index
    %6 = vector.load %arg4[%c0_8, %c0_9] : memref<8x128xf32, #tpu.memory_space<vmem>>, vector<8x128xf32>
    %7 = arith.addf %5, %6 : vector<8x128xf32>
    %c0_10 = arith.constant 0 : index
    %c0_11 = arith.constant 0 : index
    %c0_12 = arith.constant 0 : index
    %8 = vector.load %arg5[%c0_10, %c0_11, %c0_12] : memref<1x8x128xf32, #tpu.memory_space<vmem>>, vector<1x8x128xf32>
    %9 = vector.shape_cast %8 : vector<1x8x128xf32> to vector<8x128xf32>
    %10 = vector.shape_cast %7 : vector<8x128xf32> to vector<1x8x128xf32>
    tpu.vector_store %arg5[%c0_10, %c0_11, %c0_12], %10 {strides = array<i32>} : memref<1x8x128xf32, #tpu.memory_space<vmem>>, vector<1x8x128xf32>,
    return
  }
  func.func @transform_1(%arg0: i32, %arg1: i32, %arg2: memref<16xi32, #tpu.memory_space<smem>>) -> (i32, i32) {
    %c0_i32 = arith.constant 0 : i32
    %c0_i32_0 = arith.constant 0 : i32
    return %arg0, %c0_i32 : i32, i32
  }
  func.func @transform_2(%arg0: i32, %arg1: i32, %arg2: memref<16xi32, #tpu.memory_space<smem>>) -> (i32, i32, i32) {
    %c0_i32 = arith.constant 0 : i32
    %c0_i32_0 = arith.constant 0 : i32
    return %arg1, %arg0, %c0_i32 : i32, i32, i32
  }
}

</mosaic_0001>

<bundles_post_ra>
// kernel: tpu_custom_call.1
= control target key start
LH: loop header
LB: loop body
LE: loop exit
PB: predicated region body
PF: predicated region fallthrough
CT: control target
= control target key end

     0   :  { %s756_s0 = inlined_call_operand.hbm [shape: s32[16], index: 0, kind: input, shape index: {}]   ;;  %s757_s1 = inlined_call_operand.hbm [shape: f32[256,128], index: 1, kind: input, shape index: {}]   ;;  %s758_s2 = inlined_call_operand.hbm [shape: f32[64,128], index: 2, kind: input, shape index: {}]   ;;  %s759_s3 = inlined_call_operand.hbm [shape: f32[2,8,128], index: 3, kind: output, shape index: {}]  }
   0x1   :  { %s373_s14 = scalar_lea.hbm %s756_s0, 16 }
   0x2   :  { %p374_p0 = scmp.ne.s32.totalorder %s756_s0, %s373_s14  ;;  %p377_p1 = scmp.lt.u32.totalorder %s373_s14, %s756_s0 }
   0x4   :  { %p379_p2 = pnand %p377_p1, %p374_p0 }
   0x6   :  { %382 = shalt.err (!%p379_p2)  }
   0x7   :  { %s539_s19 = smov [#allocation5]  }
   0x8   :  { %9 = dma.hbm_to_smem %s756_s0, 16, %s539_s19, [#allocation4] }
   0x9   :  { %495 = dma.done.wait [#allocation4], 16 }
   0xa   :  { %496 = vsyncadd [#allocation4], 4294967280 }
   0xb   :  { %11 = sfence }
   0xc   :  { %12 = vsyncpa [#allocation7], 0 }
   0xd   :  { %13 = vsyncpa [#allocation8], 0 }
   0xe   :  { %15 = vsyncpa [#allocation8 + $0x1], 0  ;;  %s575_s22 = smov 0   ;;  %s577_s23 = smov 0  }
   0xf   :  { %s579_s24 = smov 0   ;;  %s581_s25 = smov 0  }
  0x10   :  { %s583_s26 = smov 0   ;;  %s585_s27 = smov 0  }
  0x11 LB: > { %s276_s0 = sadd.s32 4294967295, %s529_s27   ;;  %s277_s28 = sadd.s32 4294967294, %s529_s27   ;;  %s529_s27 = sphi %s585_s27, %s21_s27   ;;  %s525_s26 = sphi %s583_s26, %s779_s26   ;;  %s521_s25 = sphi %s581_s25, %s778_s25   ;;  %s517_s24 = sphi %s579_s24, %s777_s24   ;;  %s513_s23 = sphi %s577_s23, %s776_s23   ;;  %s509_s22 = sphi %s575_s22, %s775_s22  }
  0x12   : > { %s30_s29 = sadd.s32 1, %s525_s26  ;;  %s68_s30 = sadd.s32 1, %s517_s24 }
  0x13   : > { %p31_p3 = scmp.ge.s32.totalorder %s30_s29, 2  ;;  %p78_p4 = scmp.ne.s32.totalorder %s517_s24, %s513_s23 }
  0x14   : > { %p79_p5 = scmp.eq.s32.totalorder %s276_s0, 1  ;;  %p84_p6 = scmp.ne.s32.totalorder %s513_s23, %s509_s22 }
  0x15   : > { %s781_s29 = smov (%p31_p3, %s30_s29), 0  ;;  %p85_p8 = scmp.eq.s32.totalorder %s277_s28, 1 }
  0x16   : > { %p615_p7 = por %p79_p5, %p78_p4  ;;  %s63_s5 = ssub.s32 %s525_s26, %s781_s29 }
  0x17   : > { %p278_p9 = scmp.ge.s32.totalorder %s529_s27, 1  ;;  %p66_p10 = scmp.eq.s32.totalorder %s63_s5, 0 }
  0x18   : > { %s765_s4 = scalar_select %p615_p7, 1, 0 }
  0x19   : > { %p622_p11 = por %p85_p8, %p84_p6  ;;  %p92_p12 = scmp.lt.s32.totalorder %s529_s27, 3 }
  0x1a   : > { %s628_s7 = scalar_select %p66_p10, %s517_s24, %s68_s30  }
  0x1b   : > { %s766_s6 = scalar_select %p622_p11, 1, 0 }
  0x1c   : > { %p630_p13 = pnand %p278_p9, %p92_p12  ;;  %p634_p0 = scmp.eq.s32.totalorder %s276_s0, 0 }
  0x1d   : > { %s540_s10 = smov [#allocation6]   ;;  %s383_s15 = scalar_lea.hbm %s758_s2, 128 }
  0x1e   : > { %s767_s8 = scalar_select %p630_p13, 1, 0 }
  0x1f   : > { %s768_s9 = scalar_select %p634_p0, 1, 0 }
  0x20   : > { %p296_p1 = pneg %p630_p13  ;;  %s107_s11 = sshll.u32 %s540_s10, 4  ;;  %s108_s11 = int_to_ptr.vmem [resolvable:$true] %s107_s11 }
  0x21   : > { %p384_p3 = scmp.ne.s32.totalorder %s758_s2, %s383_s15  ;;  %s388_s20 = scalar_lea.hbm %s758_s2, 1024 }
  0x22   : > { %p642_p2 = pnand %p634_p0, %p296_p1  ;;  %p389_p8 = scmp.lt.u32.totalorder %s388_s20, %s383_s15 }
  0x23   : > { %p390_p9 = scmp.lt.u32.totalorder %s383_s15, %s758_s2 }
  0x24   : > { %p385_p4 = pneg %p642_p2 }
  0x25   : > { %p391_p10 = por %p390_p9, %p389_p8 }
  0x26   : > { %p386_p5 = pnand %p385_p4, %p384_p3 }
  0x28   : > { %p387_p6 = pneg %p386_p5 }
  0x2a   : > { %p392_p12 = pnand %p391_p10, %p387_p6 }
  0x2c   : > { %395 = shalt.err (!%p392_p12)
}
  0x2d   : > { %s396_s28 = scalar_lea.vmem %s108_s11, 128  ;;  %p404_p0 = scmp.lt.s32.totalorder %s108_s11, %s108_s11 }
  0x2e   : > { %p397_p1 = scmp.ne.s32.totalorder %s108_s11, %s396_s28  ;;  %p405_p13 = scmp.lt.s32.totalorder %s396_s28, %s396_s28 }
  0x30   : > { %p399_p11 = pnand %p397_p1, %p385_p4  ;;  %p406_p3 = por %p405_p13, %p404_p0 }
  0x32   : > { %p400_p7 = pneg %p399_p11 }
  0x34   : > { %p407_p5 = pnand %p406_p3, %p400_p7 }
  0x36   : > { %410 = shalt.err (!%p407_p5)
}
  0x37   : > { %299 = dma.hbm_to_vmem [thread:$0]  (!%p642_p2), %s758_s2, 128, %s108_s11, [#allocation7]  }
  0x38   : > { %p770_p8 = scmp.ne.s32.totalorder %s767_s8, 0 }
  0x39   : > { %p771_p6 = scmp.ne.s32.totalorder (!%p770_p8), %s768_s9, 0 }
  0x3a   : > { %120 = sbr.rel (%p770_p8) target bundleno = 138 (0x8a), region = 24 }
  0x41   : > { %498 = dma.done.wait (%p771_p6), [#allocation7], 128  }
  0x42   : > { %500 = vsyncadd (%p771_p6), [#allocation7], 4294967168  ;;  %s764_s10 = sand.u32 1, %s513_s23   ;;  %s283_s13 = sshll.u32 %s521_s25, 3 }
  0x43   : > { %s675_s12 = sshll.u32 %s764_s10, 3  ;;  %s678_s11 = smov 0  }
  0x44   : > { %s134_s14 = scalar_lea.vmem [#allocation9], %s675_s12 }
  0x45 LB: >> { %s144_s8 = sadd.s32 %s533_s11, %s283_s13  ;;  %s148_s15 = scalar_lea.vmem [#allocation2], %s533_s11  ;;  %s533_s11 = sphi %s678_s11, %s143_s11  }
  0x46   : >> { %s145_s9 = sld [smem:[#allocation5 + %s144_s8]]  ;;  %s156_s16 = sshll.u32 %s148_s15, 4  ;;  %s157_s16 = int_to_ptr.vmem [resolvable:$true] %s156_s16 }
  0x47   : >> { %s413_s30 = scalar_lea.hbm %s757_s1, 4096 }
  0x4c   : >> { %s284_s17 = sshll.u32 %s145_s9, 4 }
  0x4d   : >> { %s147_s20 = scalar_lea.hbm %s757_s1, %s284_s17 }
  0x4e   : >> { %s411_s21 = scalar_lea.hbm %s147_s20, 16  ;;  %p414_p11 = scmp.lt.u32.totalorder %s147_s20, %s757_s1 }
  0x4f   : >> { %p412_p7 = scmp.ne.s32.totalorder %s147_s20, %s411_s21  ;;  %p415_p13 = scmp.lt.u32.totalorder %s413_s30, %s411_s21 }
  0x50   : >> { %p417_p2 = scmp.lt.u32.totalorder %s411_s21, %s147_s20 }
  0x51   : >> { %p416_p0 = por %p415_p13, %p414_p11 }
  0x53   : >> { %p418_p4 = por %p417_p2, %p416_p0 }
  0x55   : >> { %p419_p9 = pnand %p418_p4, %p412_p7 }
  0x57   : >> { %422 = shalt.err (!%p419_p9)  }
  0x58   : >> { %s423_s8 = scalar_lea.vmem %s157_s16, 16  ;;  %s541_s9 = smov [#allocation2]  }
  0x59   : >> { %p424_p10 = scmp.ne.s32.totalorder %s157_s16, %s423_s8  ;;  %s425_s15 = sshll.u32 %s541_s9, 4  ;;  %s426_s15 = int_to_ptr.vmem [resolvable:$false] %s425_s15 }
  0x5a   : >> { %s427_s17 = scalar_lea.vmem %s426_s15, 128  ;;  %p428_p12 = scmp.lt.s32.totalorder %s157_s16, %s426_s15 }
  0x5b   : >> { %p429_p1 = scmp.lt.s32.totalorder %s427_s17, %s423_s8 }
  0x5d   : >> { %p430_p3 = por %p429_p1, %p428_p12 }
  0x5f   : >> { %p431_p5 = pnand %p430_p3, %p424_p10 }
  0x61   : >> { %434 = shalt.err (!%p431_p5)  }
  0x62   : >> { %159 = dma.hbm_to_vmem [thread:$0]  %s147_s20, 16, %s157_s16, [#allocation3] }
  0x63   : >> { %s143_s11 = sadd.s32 1, %s533_s11  }
  0x64   : >> { %p140_p8 = scmp.ge.s32.totalorder %s143_s11, 8  }
  0x65   : > { %s535_s10 = smov (%p140_p8), 0  }
  0x66   : > { %142 = sbr.rel (!%p140_p8) target bundleno = 69 (0x45), region = 82 }
  0x6d LB: >> { %501 = dma.done.wait [#allocation3], 16  ;;  %s537_s10 = sphi %s535_s10, %s165_s10  }
  0x6e   : >> { %502 = vsyncadd [#allocation3], 4294967280  ;;  %s165_s10 = sadd.s32 1, %s537_s10  }
  0x6f   : >> { %p162_p6 = scmp.ge.s32.totalorder %s165_s10, 8  }
  0x70   : > { %v168_v0 = vld [vmem:[#allocation2] sm:$0xff] (%p162_p6)  ;;  %v169_v1 = vld [vmem:[#allocation6] sm:$0xff] (%p162_p6)  ;;  %s286_s16 = sshll.u32 (%p162_p6), %s521_s25, 7  ;;  %s187_s19 = sshll.u32 (%p162_p6), %s134_s14, 4  ;;  %s707_s19 = int_to_ptr.vmem [resolvable:$true] %s187_s19 }
  0x71   : > { %164 = sbr.rel (!%p162_p6) target bundleno = 109 (0x6d), region = 93  ;;  %v170_v2 = vadd.f32 (%p162_p6), %v169_v1, %v168_v0  ;;  %s703_s18 = scalar_lea.hbm (%p162_p6), %s759_s3, %s286_s16 }
  0x72   : > { %s772_s20 = sand.u32 (%p162_p6), 1, %s513_s23   ;;  %s435_s0 = scalar_lea.vmem (%p162_p6), %s707_s19, 128 }
  0x73   : > { %171 = vst [vmem:[%s134_s14] sm:$0xff] (%p162_p6), %v170_v2  ;;  %s173_s21 = scalar_lea.sflag (%p162_p6), [#allocation8], %s772_s20  ;;  %p436_p7 = scmp.ne.s32.totalorder (%p162_p6), %s707_s19, %s435_s0 }
  0x74   : > { %p773_p11 = scmp.ne.s32.totalorder (%p162_p6), %s765_s4, 0  ;;  %s542_s25 = smov (%p162_p6), [#allocation9]  }
  0x75   : > { %s439_s28 = sshll.u32 (%p162_p6), %s542_s25, 4  ;;  %s440_s28 = int_to_ptr.vmem [resolvable:$false] %s439_s28 }
  0x76   : > { %p437_p13 = pnand (%p162_p6), %p436_p7, %p773_p11  ;;  %s441_s30 = scalar_lea.vmem (%p162_p6), %s440_s28, 256 }
  0x77   : > { %p442_p2 = scmp.lt.s32.totalorder (%p162_p6), %s707_s19, %s440_s28  ;;  %p443_p4 = scmp.lt.s32.totalorder (%p162_p6), %s441_s30, %s435_s0 }
  0x78   : > { %p438_p0 = pneg %p437_p13 }
  0x79   : > { %p444_p9 = por %p443_p4, %p442_p2 }
  0x7b   : > { %p445_p10 = pnand %p444_p9, %p438_p0 }
  0x7d   : > { %448 = shalt.err (!%p445_p10)
}
  0x7e   : > { %s449_s12 = scalar_lea.hbm %s703_s18, 128  ;;  %s453_s8 = scalar_lea.hbm %s759_s3, 256 }
  0x7f   : > { %p450_p12 = scmp.ne.s32.totalorder %s703_s18, %s449_s12  ;;  %p454_p5 = scmp.lt.u32.totalorder %s703_s18, %s759_s3 }
  0x80   : > { %p455_p8 = scmp.lt.u32.totalorder %s453_s8, %s449_s12  ;;  %p457_p7 = scmp.lt.u32.totalorder %s449_s12, %s703_s18 }
  0x81   : > { %p451_p1 = pnand %p450_p12, %p773_p11 }
  0x82   : > { %p456_p6 = por %p455_p8, %p454_p5 }
  0x83   : > { %p452_p3 = pneg %p451_p1 }
  0x84   : > { %p458_p13 = por %p457_p7, %p456_p6 }
  0x86   : > { %p459_p0 = pnand %p458_p13, %p452_p3 }
  0x88   : > { %462 = shalt.err (!%p459_p0)
}
  0x89   : > { %294 = dma.vmem_to_hbm [thread:$0]  (%p773_p11), %s707_s19, 128, %s703_s18, %s173_s21  }
  0x8a PF: > { %p306_p2 = scmp.ge.s32.totalorder %s529_s27, 2  ;;  %s199_s17 = sand.u32 1, %s509_s22  }
  0x8b   : > { %p774_p4 = scmp.ne.s32.totalorder %s766_s6, 0  ;;  %s200_s10 = scalar_lea.sflag [#allocation8], %s199_s17 }
  0x8d   : > { %p301_p9 = pnand %p306_p2, %p774_p4 }
  0x8f   : > { %504 = dma.done.wait (!%p301_p9), %s200_s10, 128  }
  0x90   : > { %506 = vsyncadd (!%p301_p9), %s200_s10, 4294967168  ;;  %s21_s27 = sadd.s32 1, %s529_s27   ;;  %s775_s22 = smov %s513_s23 }
  0x91   : > { %p18_p10 = scmp.ge.s32.totalorder %s21_s27, 4   ;;  %s776_s23 = smov %s517_s24 }
  0x92   : > { %s777_s24 = smov %s628_s7  ;;  %s778_s25 = smov %s525_s26 }
  0x93   : > { %s779_s26 = smov %s781_s29  ;;  %20 = sbr.rel (!%p18_p10) target bundleno = 17 (0x11), region = 104 }
  0x9a   :  { %205 = vsyncpa [#allocation7], 1 }
  0x9b   :  { %207 = vsyncpa [#allocation7 + $0x1], 1 }
  0x9c   :  { %208 = vsyncpa [#allocation8], 1 }
  0x9d   :  { %210 = vsyncpa [#allocation8 + $0x1], 1 }
  0x9e   :  { %211 = vsyncmov [#allocation3] }
  0xa1   :  { %s212_s4 = vpop.sfrf %211 }
  0xa2   :  { %p289_p11 = scmp.ne.s32.totalorder %s212_s4, 0 }
  0xa4   :  { %216 = shalt.err (%p289_p11)  }

</bundles_post_ra>
